<compile_context>
chip_gen: v5e
topology: v5e:2x2
jax: 0.10.0
libtpu: 0.0.40
codegen_flags: <defaults>
</compile_context>

<pallas_src>
import jax
import jax.numpy as jnp
from jax.experimental import pallas as pl
from jax.experimental.pallas import tpu as pltpu


HIDDEN = 32
LATENT = 16
BATCH = 8


def _vpolicy_kernel(state_ref, wpack_ref, bpack_ref, out_ref):
    H, L = HIDDEN, LATENT

    h_su = state_ref[...]                          # [Tb, 2H]  == cat([h_s, h_u], -1)
    h_s = h_su[:, :H]                              # [Tb, H]
    # h_u is consumed only through the fused matmul below.

    # Fused fc2|fc1: one [Tb,2H] @ [2H,2H] pass; cols 0:H -> pre2, cols H:2H -> f1.
    w_fused = wpack_ref[0:2 * H, :]                # [2H, 2H]
    b_fused = bpack_ref[0:1, :]                    # [1, 2H] == [b2 | b1]
    pre = jnp.dot(h_su, w_fused, preferred_element_type=jnp.float32) + b_fused
    pre2 = pre[:, :H]                              # fc2(cat(h_s, h_u))
    f1 = pre[:, H:]                                # fc1(h_u)

    # log_softmax over feature dim.
    m = jnp.max(pre2, axis=-1, keepdims=True)
    shifted = pre2 - m
    lse = jnp.log(jnp.sum(jnp.exp(shifted), axis=-1, keepdims=True))
    h_s_x = shifted - lse                          # [Tb, H]

    # Gated combination then fc3.
    gated = h_s_x * h_s + (1.0 - h_s_x) * f1
    w3 = wpack_ref[2 * H:3 * H, :2 * L]            # [H, 2L]
    b3 = bpack_ref[1:2, :2 * L]                    # [1, 2L]
    enc = jnp.dot(gated, w3, preferred_element_type=jnp.float32) + b3

    # Reparameterized latent sample (std_z broadcast over batch, as in PyTorch).
    mu = enc[:, :L]
    log_sigma = enc[:, L:]
    stdz = bpack_ref[3:4, :L]                      # [1, L]
    z = mu + jnp.exp(log_sigma) * stdz

    # fc4 + tanh decoder.
    w4 = wpack_ref[3 * H:3 * H + L, :H]            # [L, H]
    b4 = bpack_ref[2:3, :H]                        # [1, H]
    dec = jnp.tanh(jnp.dot(z, w4, preferred_element_type=jnp.float32) + b4)

    # Single lane-contiguous output block: [dec | enc].
    out_ref[...] = jnp.concatenate([dec, enc], axis=-1)


def pack_params(params):
    """Pack 4 weights into one [3H+L, 2H] array; biases into one [4, 2H] base."""
    H, L = HIDDEN, LATENT
    wpack = jnp.zeros((3 * H + L, 2 * H), jnp.float32)
    wpack = wpack.at[:2 * H, :H].set(params["w2"])          # fused cols 0:H
    wpack = wpack.at[H:2 * H, H:].set(params["w1"])         # fused cols H:2H (h_u rows)
    wpack = wpack.at[2 * H:3 * H, :2 * L].set(params["w3"])
    wpack = wpack.at[3 * H:, :H].set(params["w4"])

    bias_base = jnp.zeros((4, 2 * H), jnp.float32)
    bias_base = bias_base.at[0, :H].set(params["b2"])
    bias_base = bias_base.at[0, H:].set(params["b1"])
    bias_base = bias_base.at[1, :2 * L].set(params["b3"])
    bias_base = bias_base.at[2, :H].set(params["b4"])
    # row 3 holds std_z (filled per call).
    return wpack, bias_base


def variational_policy_forward(state, wpack, bias_base, std_z, *, tile_b=256):
    """state: [B, 3H] f32.  std_z: [L] f32 (the shared N(0,1) sample).

    Returns (decoder_out [B,H], z_mean [B,L], z_log_sigma [B,L]).
    """
    H, L = HIDDEN, LATENT
    B = state.shape[0]

    # Only the first 2H columns of state are used by forward(); don't DMA x_embed.
    state2h = state[:, :2 * H]

    # Pad batch to a tile boundary (>= 8 sublanes).
    Bp = max(8, -(-B // 8) * 8)
    tile = min(tile_b, Bp)
    Bp = -(-Bp // tile) * tile
    if Bp != B:
        state2h = jnp.pad(state2h, ((0, Bp - B), (0, 0)))

    bpack = bias_base.at[3, :L].set(std_z)

    out = pl.pallas_call(
        _vpolicy_kernel,
        out_shape=jax.ShapeDtypeStruct((Bp, H + 2 * L), jnp.float32),
        grid_spec=pltpu.PrefetchScalarGridSpec(
            num_scalar_prefetch=0,
            grid=(Bp // tile,),
            in_specs=[
                pl.BlockSpec((tile, 2 * H), lambda i: (i, 0)),
                pl.BlockSpec((3 * H + L, 2 * H), lambda i: (0, 0)),
                pl.BlockSpec((4, 2 * H), lambda i: (0, 0)),
            ],
            out_specs=pl.BlockSpec((tile, H + 2 * L), lambda i: (i, 0)),
        ),
        compiler_params=pltpu.CompilerParams(
            dimension_semantics=("parallel",)),
    )(state2h, wpack, bpack)

    out = out[:B]
    dec = out[:, :H]
    mu = out[:, H:H + L]
    log_sigma = out[:, H + L:]
    return dec, mu, log_sigma


def init_params(key):
    ks = jax.random.split(key, 8)
    H, L = HIDDEN, LATENT

    def lin(kw, kb, fan_in, fan_out):
        scale = 1.0 / jnp.sqrt(jnp.float32(fan_in))
        w = jax.random.uniform(kw, (fan_in, fan_out), jnp.float32, -scale, scale)
        b = jax.random.uniform(kb, (fan_out,), jnp.float32, -scale, scale)
        return w, b

    w1, b1 = lin(ks[0], ks[4], H, H)
    w2, b2 = lin(ks[1], ks[5], 2 * H, H)
    w3, b3 = lin(ks[2], ks[6], H, 2 * L)
    w4, b4 = lin(ks[3], ks[7], L, H)
    return {"w1": w1, "b1": b1, "w2": w2, "b2": b2,
            "w3": w3, "b3": b3, "w4": w4, "b4": b4}


def reference_forward(state, params, std_z):
    """Pure-JAX reference for correctness check (mirrors the PyTorch forward)."""
    H, L = HIDDEN, LATENT
    h_s, h_u = state[:, :H], state[:, H:2 * H]
    pre2 = state[:, :2 * H] @ params["w2"] + params["b2"]
    h_s_x = jax.nn.log_softmax(pre2, axis=-1)
    f1 = h_u @ params["w1"] + params["b1"]
    enc = (h_s_x * h_s + (1.0 - h_s_x) * f1) @ params["w3"] + params["b3"]
    mu, log_sigma = enc[:, :L], enc[:, L:]
    z = mu + jnp.exp(log_sigma) * std_z
    dec = jnp.tanh(z @ params["w4"] + params["b4"])
    return dec, mu, log_sigma


if __name__ == "__main__":
    key = jax.random.PRNGKey(0)
    k_state, k_params, k_noise = jax.random.split(key, 3)

    # state = [h_s | h_u | x_embed]; x_embed (last HIDDEN cols) is unused by forward().
    state = jax.random.normal(k_state, (BATCH, 3 * HIDDEN), jnp.float32)
    params = init_params(k_params)
    # TODO(synk): PyTorch samples std_z in-forward with torch.normal_(); here the
    # shared [LATENT] N(0,1) sample is passed in explicitly (same broadcast semantics).
    std_z = jax.random.normal(k_noise, (LATENT,), jnp.float32)

    wpack, bias_base = pack_params(params)

    dec, mu, log_sigma = variational_policy_forward(state, wpack, bias_base, std_z)
    jax.block_until_ready((dec, mu, log_sigma))

    ref_dec, ref_mu, ref_ls = reference_forward(state, params, std_z)
    assert jnp.allclose(dec, ref_dec, atol=1e-5, rtol=1e-5)
    assert jnp.allclose(mu, ref_mu, atol=1e-5, rtol=1e-5)
    assert jnp.allclose(log_sigma, ref_ls, atol=1e-5, rtol=1e-5)

    print("KERNEL_OK")
</pallas_src>

<mosaic_0001>
module attributes {stable_mosaic.version = 11 : i64} {
  func.func @_vpolicy_kernel(%arg0: i32, %arg1: memref<8x64xf32, #tpu.memory_space<vmem>>, %arg2: memref<112x64xf32, #tpu.memory_space<vmem>>, %arg3: memref<4x64xf32, #tpu.memory_space<vmem>>, %arg4: memref<8x64xf32, #tpu.memory_space<vmem>>) attributes {dimension_semantics = [#tpu.dimension_semantics<parallel>], iteration_bounds = array<i64: 1>, scalar_prefetch = 0 : i64, scratch_operands = 0 : i64, tpu.core_type = #tpu.core_type<tc>, window_params = [{transform_indices = @transform_0, window_bounds = array<i64: 8, 64>}, {pipeline_mode = #tpu.pipeline_mode<synchronous>, transform_indices = @transform_1, window_bounds = array<i64: 112, 64>}, {pipeline_mode = #tpu.pipeline_mode<synchronous>, transform_indices = @transform_2, window_bounds = array<i64: 4, 64>}, {transform_indices = @transform_3, window_bounds = array<i64: 8, 64>}]} {
    %c0 = arith.constant 0 : index
    %c0_0 = arith.constant 0 : index
    %0 = vector.load %arg1[%c0, %c0_0] : memref<8x64xf32, #tpu.memory_space<vmem>>, vector<8x64xf32>
    %1 = vector.extract_strided_slice %0 {offsets = [0, 0], sizes = [8, 32], strides = [1, 1]} : vector<8x64xf32> to vector<8x32xf32>
    %c0_1 = arith.constant 0 : index
    %c0_2 = arith.constant 0 : index
    %2 = vector.load %arg2[%c0_1, %c0_2] : memref<112x64xf32, #tpu.memory_space<vmem>>, vector<64x64xf32>
    %c0_3 = arith.constant 0 : index
    %c0_4 = arith.constant 0 : index
    %3 = vector.load %arg3[%c0_3, %c0_4] : memref<4x64xf32, #tpu.memory_space<vmem>>, vector<1x64xf32>
    %cst = arith.constant dense<0.000000e+00> : vector<8x64xf32>
    %4 = tpu.matmul %0, %2, %cst {dimension_numbers = #tpu.dot_dimension_numbers<[1], [0], [0], [1], [0, 0, 1, 1], [], []>} : vector<8x64xf32>, vector<64x64xf32>, vector<8x64xf32> -> vector<8x64xf32>
    %5 = vector.broadcast %3 : vector<1x64xf32> to vector<8x64xf32>
    %6 = arith.addf %4, %5 : vector<8x64xf32>
    %7 = vector.extract_strided_slice %6 {offsets = [0, 0], sizes = [8, 32], strides = [1, 1]} : vector<8x64xf32> to vector<8x32xf32>
    %8 = vector.extract_strided_slice %6 {offsets = [0, 32], sizes = [8, 32], strides = [1, 1]} : vector<8x64xf32> to vector<8x32xf32>
    %cst_5 = arith.constant dense<0xFF800000> : vector<8xf32>
    %9 = vector.multi_reduction <maximumf>, %7, %cst_5 [1] : vector<8x32xf32> to vector<8xf32>
    %10 = vector.shape_cast %9 : vector<8xf32> to vector<8x1xf32>
    %11 = vector.broadcast %10 : vector<8x1xf32> to vector<8x32xf32>
    %12 = arith.subf %7, %11 : vector<8x32xf32>
    %13 = math.exp %12 : vector<8x32xf32>
    %cst_6 = arith.constant dense<0.000000e+00> : vector<8xf32>
    %14 = vector.multi_reduction <add>, %13, %cst_6 [1] : vector<8x32xf32> to vector<8xf32>
    %15 = vector.shape_cast %14 : vector<8xf32> to vector<8x1xf32>
    %16 = math.log %15 : vector<8x1xf32>
    %17 = vector.broadcast %16 : vector<8x1xf32> to vector<8x32xf32>
    %18 = arith.subf %12, %17 : vector<8x32xf32>
    %19 = arith.mulf %18, %1 : vector<8x32xf32>
    %cst_7 = arith.constant 1.000000e+00 : f32
    %20 = vector.broadcast %cst_7 : f32 to vector<8x32xf32>
    %21 = arith.subf %20, %18 : vector<8x32xf32>
    %22 = arith.mulf %21, %8 : vector<8x32xf32>
    %23 = arith.addf %19, %22 : vector<8x32xf32>
    %c64 = arith.constant 64 : index
    %c0_8 = arith.constant 0 : index
    %24 = vector.load %arg2[%c64, %c0_8] : memref<112x64xf32, #tpu.memory_space<vmem>>, vector<32x32xf32>
    %c1 = arith.constant 1 : index
    %c0_9 = arith.constant 0 : index
    %25 = vector.load %arg3[%c1, %c0_9] : memref<4x64xf32, #tpu.memory_space<vmem>>, vector<1x32xf32>
    %cst_10 = arith.constant dense<0.000000e+00> : vector<8x32xf32>
    %26 = tpu.matmul %23, %24, %cst_10 {dimension_numbers = #tpu.dot_dimension_numbers<[1], [0], [0], [1], [0, 0, 1, 1], [], []>} : vector<8x32xf32>, vector<32x32xf32>, vector<8x32xf32> -> vector<8x32xf32>
    %27 = vector.broadcast %25 : vector<1x32xf32> to vector<8x32xf32>
    %28 = arith.addf %26, %27 : vector<8x32xf32>
    %29 = vector.extract_strided_slice %28 {offsets = [0, 0], sizes = [8, 16], strides = [1, 1]} : vector<8x32xf32> to vector<8x16xf32>
    %30 = vector.extract_strided_slice %28 {offsets = [0, 16], sizes = [8, 16], strides = [1, 1]} : vector<8x32xf32> to vector<8x16xf32>
    %c3 = arith.constant 3 : index
    %c0_11 = arith.constant 0 : index
    %31 = vector.load %arg3[%c3, %c0_11] : memref<4x64xf32, #tpu.memory_space<vmem>>, vector<1x16xf32>
    %32 = math.exp %30 : vector<8x16xf32>
    %33 = vector.broadcast %31 : vector<1x16xf32> to vector<8x16xf32>
    %34 = arith.mulf %32, %33 : vector<8x16xf32>
    %35 = arith.addf %29, %34 : vector<8x16xf32>
    %c96 = arith.constant 96 : index
    %c0_12 = arith.constant 0 : index
    %36 = vector.load %arg2[%c96, %c0_12] : memref<112x64xf32, #tpu.memory_space<vmem>>, vector<16x32xf32>
    %c2 = arith.constant 2 : index
    %c0_13 = arith.constant 0 : index
    %37 = vector.load %arg3[%c2, %c0_13] : memref<4x64xf32, #tpu.memory_space<vmem>>, vector<1x32xf32>
    %cst_14 = arith.constant dense<0.000000e+00> : vector<8x32xf32>
    %38 = tpu.matmul %35, %36, %cst_14 {dimension_numbers = #tpu.dot_dimension_numbers<[1], [0], [0], [1], [0, 0, 1, 1], [], []>} : vector<8x16xf32>, vector<16x32xf32>, vector<8x32xf32> -> vector<8x32xf32>
    %39 = vector.broadcast %37 : vector<1x32xf32> to vector<8x32xf32>
    %40 = arith.addf %38, %39 : vector<8x32xf32>
    %41 = math.tanh %40 : vector<8x32xf32>
    %42 = tpu.concatenate %41, %28 in 1 : vector<8x32xf32>, vector<8x32xf32> -> vector<8x64xf32>
    %c0_15 = arith.constant 0 : index
    %c0_16 = arith.constant 0 : index
    %43 = vector.load %arg4[%c0_15, %c0_16] : memref<8x64xf32, #tpu.memory_space<vmem>>, vector<8x64xf32>
    tpu.vector_store %arg4[%c0_15, %c0_16], %42 {strides = array<i32>} : memref<8x64xf32, #tpu.memory_space<vmem>>, vector<8x64xf32>,
    return
  }
  func.func @transform_0(%arg0: i32) -> (i32, i32) {
    %c0_i32 = arith.constant 0 : i32
    %c0_i32_0 = arith.constant 0 : i32
    return %arg0, %c0_i32 : i32, i32
  }
  func.func @transform_1(%arg0: i32) -> (i32, i32) {
    %c0_i32 = arith.constant 0 : i32
    %c0_i32_0 = arith.constant 0 : i32
    %c0_i32_1 = arith.constant 0 : i32
    return %c0_i32, %c0_i32_0 : i32, i32
  }
  func.func @transform_2(%arg0: i32) -> (i32, i32) {
    %c0_i32 = arith.constant 0 : i32
    %c0_i32_0 = arith.constant 0 : i32
    %c0_i32_1 = arith.constant 0 : i32
    return %c0_i32, %c0_i32_0 : i32, i32
  }
  func.func @transform_3(%arg0: i32) -> (i32, i32) {
    %c0_i32 = arith.constant 0 : i32
    %c0_i32_0 = arith.constant 0 : i32
    return %arg0, %c0_i32 : i32, i32
  }
}

</mosaic_0001>

<bundles_post_ra>
// kernel: tpu_custom_call.1
= control target key start
LH: loop header
LB: loop body
LE: loop exit
PB: predicated region body
PF: predicated region fallthrough
CT: control target
= control target key end

     0   :  { %s302_s0 = inlined_call_operand.vmem [shape: f32[8,64], index: 0, kind: input, shape index: {}]   ;;  %s303_s1 = inlined_call_operand.vmem [shape: f32[112,64], index: 1, kind: input, shape index: {}]   ;;  %s304_s2 = inlined_call_operand.vmem [shape: f32[4,64], index: 2, kind: input, shape index: {}]   ;;  %s305_s3 = inlined_call_operand.hbm [shape: f32[8,64], index: 3, kind: output, shape index: {}]  }
   0x1   :  { %v23_v0 = vld [vmem:[%s303_s1 + $0x38] sm:$0xff]  ;;  %v22_v1 = vld [vmem:[%s303_s1 + $0x30] sm:$0xff]  ;;  %v21_v2 = vld [vmem:[%s303_s1 + $0x28] sm:$0xff] }
   0x2   :  { %38 = vmatpush.msra.mxu0 %v23_v0  ;;  %v20_v3 = vld [vmem:[%s303_s1 + $0x20] sm:$0xff] }
   0x4   :  { %39 = vmatpush.msra.mxu0 %v22_v1 }
   0x5   :  { %8 = vsyncpa [#allocation3], 0  ;;  %v19_v4 = vld [vmem:[%s303_s1 + $0x18] sm:$0xff]  ;;  %v18_v5 = vld [vmem:[%s303_s1 + $0x10] sm:$0xff]  ;;  %vm26_vm0 = vcmask 523264   ;;  %vm50_vm1 = vcmask 261120  }
   0x6   :  { %40 = vmatpush.msra.mxu0 %v21_v2  ;;  %v17_v6 = vld [vmem:[%s303_s1 + $0x8] sm:$0xff]  ;;  %v16_v7 = vld [vmem:[%s303_s1] sm:$0xff]  ;;  %s211_s5 = smov 96   ;;  %v74_v18 = vld [vmem:[%s303_s1 + $0x58] sm:$0xff]  ;;  %s212_s15 = smov 16   ;;  %vm118_vm2 = vcmask 130048  }
   0x7   :  { %v15_v8 = vld [vmem:[%s302_s0] sm:$0xff]  ;;  %92 = vmatpush.msra.mxu1 %v74_v18  ;;  %v73_v19 = vld [vmem:[%s303_s1 + $0x50] sm:$0xff]  ;;  %v72_v20 = vld [vmem:[%s303_s1 + $0x48] sm:$0xff]  ;;  %s213_s20 = smov 112   ;;  %s214_s21 = smov 32  }
   0x8   :  { %41 = vmatpush.msra.mxu0 %v20_v3  ;;  %v173_v9 = vld [vmem:[%s304_s2] ss:$0 sm:$0xff]  ;;  %v174_v22 = vld [vmem:[%s304_s2 + $0x3] ss:$0 sm:$0xff]  ;;  %v115_v32 = vld [vmem:[%s303_s1 + $0x68] sm:$0xff]  ;;  %s215_s26 = smov [#allocation2]  }
   0x9   :  { %93 = vmatpush.msra.mxu1 %v73_v19  ;;  %v71_v21 = vld [vmem:[%s303_s1 + $0x40] sm:$0xff]  ;;  %136 = vmatpush.msra.mxu2 %v115_v32  ;;  %s154_s27 = sshll.u32 %s215_s26, 4  ;;  %s156_s30 = sshll.u32 %s305_s3, 4  ;;  %s155_s27 = int_to_ptr.vmem [resolvable:$true] %s154_s27  ;;  %s157_s30 = int_to_ptr.hbm [resolvable:$true] %s156_s30 }
   0xa   :  { %42 = vmatpush.msra.mxu0 %v19_v4  ;;  %v175_v33 = vld [vmem:[%s304_s2 + $0x1] ss:$0 sm:$0xff]  ;;  %v176_v43 = vld [vmem:[%s304_s2 + $0x2] ss:$0 sm:$0xff] }
   0xb   :  { %94 = vmatpush.msra.mxu1 %v72_v20  ;;  %v114_v40 = vld [vmem:[%s303_s1 + $0x60] sm:$0xff] }
   0xc   :  { %43 = vmatpush.msra.mxu0 %v18_v5  ;;  %137 = vmatpush.msra.mxu2 %v114_v40 }
   0xd   :  { %95 = vmatpush.msra.mxu1 %v71_v21 }
   0xe   :  { %44 = vmatpush.msra.mxu0 %v17_v6 }
  0x10   :  { %45 = vmatpush.msra.mxu0 %v16_v7 }
  0x11   :  { %165 = vmatmul.msk.f32.vlgmr.msra.gmra.mxu0 %vm26_vm0, %v15_v8 }
  0x8e   :  { %v47_v10 = vpop.f32.mrf.mxu0 }
  0x8f   :  { %v48_v11 = vadd.f32 %v173_v9, %v47_v10 }
  0x91   :  { %66 = vrot.lane.b32.xlu1 %v48_v11, %s211_s5  ;;  %v51_v12 = vsel %vm50_vm1, %v48_v11, -inf }
  0x92   :  { %52 = vmax.xlane.f32.xlu0 %v51_v12 }
  0x99   :  { %105 = vrot.lane.b32.xlu1 %v174_v22, %s212_s15 }
 0x103   :  { %v67_v28 = vpop.permute.xlu1 %66 }
 0x105   :  { %v53_v13 = vpop.xlane.xlu0 %52 }
 0x106   :  { %v54_v14 = vsub.f32 %v48_v11, %v53_v13 }
 0x108   :  { %v55_v15 = vmul.f32 1.442695, %v54_v14 }
 0x10a   :  { %177 = vpow2.f32 %v55_v15 }
 0x10b   :  { %v106_v37 = vpop.permute.xlu1 %105 }
 0x110   :  { %v178_v16 = vpop.eup %177 }
 0x111   :  { %v57_v17 = vsel %vm50_vm1, %v178_v16, 0.0 }
 0x112   :  { %58 = vadd.xlane.f32.xlu0 %v57_v17 }
 0x185   :  { %v59_v23 = vpop.xlane.xlu0 %58 }
 0x186   :  { %179 = vlog2.f32 %v59_v23 }
 0x18c   :  { %v180_v24 = vpop.eup %179 }
 0x18d   :  { %v61_v25 = vmul.f32 0.6931472, %v180_v24 }
 0x18f   :  { %v62_v26 = vsub.f32 %v54_v14, %v61_v25 }
 0x191   :  { %v64_v27 = vsub.f32 1.0, %v62_v26  ;;  %v63_v29 = vmul.f32 %v62_v26, %v15_v8 }
 0x193   :  { %v69_v30 = vmul.f32 %v67_v28, %v64_v27 }
 0x195   :  { %v70_v31 = vadd.f32 %v69_v30, %v63_v29 }
 0x197   :  { %166 = vmatmul.msk.f32.vlgmr.msra.gmra.mxu1 %vm50_vm1, %v70_v31 }
 0x214   :  { %v97_v34 = vpop.f32.mrf.mxu1 }
 0x215   :  { %v98_v35 = vadd.f32 %v175_v33, %v97_v34 }
 0x217   :  { %v101_v36 = vmul.f32 1.442695, %v98_v35 }
 0x219   :  { %181 = vpow2.f32 %v101_v36 }
 0x21f   :  { %v182_v38 = vpop.eup %181 }
 0x220   :  { %v108_v39 = vmul.f32 %v182_v38, %v106_v37 }
 0x222   :  { %110 = vrot.lane.b32.xlu2 %v108_v39, %s213_s20 }
 0x22a   :  { %144 = vrot.lane.b32.xlu2 %v98_v35, %s214_s21 }
 0x27c   :  { %v111_v41 = vpop.permute.xlu2 %110 }
 0x27d   :  { %v113_v42 = vadd.f32 %v111_v41, %v98_v35 }
 0x27f   :  { %167 = vmatmul.msk.f32.vlgmr.msra.gmra.mxu2 %vm118_vm2, %v113_v42 }
 0x284   :  { %v145_v47 = vpop.permute.xlu2 %144 }
 0x302   :  { %v139_v44 = vpop.f32.mrf.mxu2 }
 0x303   :  { %v140_v45 = vadd.f32 %v176_v43, %v139_v44 }
 0x305   :  { %183 = vtanh.f32 %v140_v45 }
 0x30b   :  { %v184_v46 = vpop.eup %183 }
 0x30c   :  { %v147_v48 = vsel %vm50_vm1, %v184_v46, %v145_v47 }
 0x30d   :  { %148 = vst.msk [vmem:[#allocation2] sm:$0xff] %vm26_vm0, %v147_v48 }
 0x30e   :  { %159 = dma.vmem_to_hbm [thread:$0]  %s155_s27, 128, %s157_s30, [#allocation3]  }
 0x30f   :  { %209 = dma.done.wait [#allocation3], 128  }
 0x310   :  { %210 = vsyncadd [#allocation3], 4294967168 }
 0x311   :  { %164 = vsyncpa [#allocation3], 1 }

</bundles_post_ra>
